<compile_context>
chip_gen: v7x
topology: tpu7x:2x2x1
jax: 0.10.0
libtpu: 0.0.40
codegen_flags: <defaults>
</compile_context>

<pallas_src>
import jax
import jax.numpy as jnp
from jax.experimental import pallas as pl
from jax.experimental.pallas import tpu as pltpu

LANES = 128
DESIRED_TILE_ROWS = 2048   # 1 MiB per f32 input block
NUM_SHARDS = 2             # uses both TCs on v7x; harmless on v5e/v6e


def _cdiv(a, b):
    return -(-a // b)


def _make_mse_kernel(tile_rows, steps_per_shard, valid_rows):
    """Build the kernel with all sizing constants baked in at trace time."""

    def kernel(p_ref, t_ref, out_ref, acc_ref):
        s = pl.program_id(0)      # parallel shard axis
        j = pl.program_id(1)      # reduction axis (arbitrary)

        @pl.when(j == 0)
        def _():
            acc_ref[...] = jnp.zeros_like(acc_ref)

        # Unclamped global tile index -> start row, used to mask any rows the
        # (over-covering / clamped) block reads past the real data.
        tile_idx = s * steps_per_shard + j
        start_row = tile_idx * tile_rows

        diff = p_ref[...].astype(jnp.float32) - t_ref[...].astype(jnp.float32)
        sq = diff * diff

        row_ids = jax.lax.broadcasted_iota(jnp.int32, (tile_rows, LANES), 0)
        valid = (start_row + row_ids) < valid_rows
        sq = jnp.where(valid, sq, 0.0)

        # Reduce (tile_rows, 128) -> (8, 128) with elementwise vreg adds
        # (reduction over the leading, non-lane/non-sublane axis => pure VPU).
        partial = jnp.sum(sq.reshape(tile_rows // 8, 8, LANES), axis=0)
        acc_ref[...] += partial

        @pl.when(j == steps_per_shard - 1)
        def _():
            out_ref[0] = acc_ref[...]

    return kernel


def mse_loss(predicted, target, *, desired_tile_rows=DESIRED_TILE_ROWS,
             num_shards=NUM_SHARDS):
    assert predicted.shape == target.shape, "shapes must match (no broadcasting)"
    n = predicted.size
    assert n > 0, "MSELoss of empty tensor is undefined"

    p = predicted.reshape(-1)
    t = target.reshape(-1)

    # Lane-dense (rows_slab, 128) view of the flattened inputs. Only pad when
    # the flat length is not a multiple of 128 (or shorter than one 8x128
    # tile); 128-aligned inputs are re-viewed with zero extra HBM traffic.
    rows = _cdiv(n, LANES)           # rows that contain real data
    rows_slab = max(rows, 8)
    pad = rows_slab * LANES - n
    if pad:
        p = jnp.pad(p, (0, pad))
        t = jnp.pad(t, (0, pad))
    p2 = p.reshape(rows_slab, LANES)
    t2 = t.reshape(rows_slab, LANES)

    # Tile sizing: multiple of 8 sublanes, no larger than the slab.
    tile_rows = min(desired_tile_rows, (rows_slab // 8) * 8)
    num_tiles = _cdiv(rows_slab, tile_rows)
    shards = max(1, min(num_shards, num_tiles))
    steps = _cdiv(num_tiles, shards)

    def in_map(s, j):
        # Clamp so over-coverage steps re-read a valid block; those rows are
        # fully masked inside the kernel, so correctness is unaffected.
        return (jnp.minimum(s * steps + j, num_tiles - 1), 0)

    kernel = _make_mse_kernel(tile_rows, steps, rows)

    partials = pl.pallas_call(
        kernel,
        out_shape=jax.ShapeDtypeStruct((shards, 8, LANES), jnp.float32),
        grid_spec=pltpu.PrefetchScalarGridSpec(
            num_scalar_prefetch=0,
            grid=(shards, steps),
            in_specs=[
                pl.BlockSpec((tile_rows, LANES), in_map),
                pl.BlockSpec((tile_rows, LANES), in_map),
            ],
            out_specs=pl.BlockSpec((1, 8, LANES), lambda s, j: (s, 0, 0)),
            scratch_shapes=[pltpu.VMEM((8, LANES), jnp.float32)],
        ),
        compiler_params=pltpu.CompilerParams(
            dimension_semantics=("parallel", "arbitrary"),
        ),
    )(p2, t2)

    # Tiny final cross-lane/cross-shard reduce + mean scale (n is static).
    return jnp.sum(partials) / n


if __name__ == "__main__":
    key = jax.random.PRNGKey(0)
    k1, k2 = jax.random.split(key)
    shape = (2, 4, 16, 16)  # NCHW-like small example
    predicted = jax.random.normal(k1, shape, dtype=jnp.float32)
    target = jax.random.normal(k2, shape, dtype=jnp.float32)

    loss = mse_loss(predicted, target)
    jax.block_until_ready(loss)

    # Sanity check against plain JAX reference.
    ref = jnp.mean((predicted - target) ** 2)
    assert jnp.allclose(loss, ref, rtol=1e-5, atol=1e-6), (loss, ref)

    print("KERNEL_OK")
</pallas_src>

<mosaic_0001>
module attributes {stable_mosaic.version = 11 : i64} {
  func.func @kernel(%arg0: i32, %arg1: i32, %arg2: memref<16x128xf32, #tpu.memory_space<vmem>>, %arg3: memref<16x128xf32, #tpu.memory_space<vmem>>, %arg4: memref<1x8x128xf32, #tpu.memory_space<vmem>>, %arg5: memref<8x128xf32, #tpu.memory_space<vmem>>) attributes {dimension_semantics = [#tpu.dimension_semantics<parallel>, #tpu.dimension_semantics<arbitrary>], iteration_bounds = array<i64: 1, 1>, scalar_prefetch = 0 : i64, scratch_operands = 1 : i64, tpu.core_type = #tpu.core_type<tc>, window_params = [{transform_indices = @transform_0, window_bounds = array<i64: 16, 128>}, {transform_indices = @transform_1, window_bounds = array<i64: 16, 128>}, {transform_indices = @transform_2, window_bounds = array<i64: 1, 8, 128>}]} {
    %c0_i32 = arith.constant 0 : i32
    %0 = arith.cmpi eq, %arg1, %c0_i32 : i32
    %1 = arith.extui %0 : i1 to i32
    %c0_i32_0 = arith.constant 0 : i32
    %2 = arith.cmpi ne, %1, %c0_i32_0 : i32
    scf.if %2 {
      %cst_12 = arith.constant 0.000000e+00 : f32
      %25 = vector.broadcast %cst_12 : f32 to vector<8x128xf32>
      %c0_13 = arith.constant 0 : index
      %c0_14 = arith.constant 0 : index
      %26 = vector.load %arg5[%c0_13, %c0_14] : memref<8x128xf32, #tpu.memory_space<vmem>>, vector<8x128xf32>
      tpu.vector_store %arg5[%c0_13, %c0_14], %25 {strides = array<i32>} : memref<8x128xf32, #tpu.memory_space<vmem>>, vector<8x128xf32>,
    } else {
    }
    %c1_i32 = arith.constant 1 : i32
    %3 = arith.muli %arg0, %c1_i32 : i32
    %4 = arith.addi %3, %arg1 : i32
    %c16_i32 = arith.constant 16 : i32
    %5 = arith.muli %4, %c16_i32 : i32
    %c0 = arith.constant 0 : index
    %c0_1 = arith.constant 0 : index
    %6 = vector.load %arg2[%c0, %c0_1] : memref<16x128xf32, #tpu.memory_space<vmem>>, vector<16x128xf32>
    %c0_2 = arith.constant 0 : index
    %c0_3 = arith.constant 0 : index
    %7 = vector.load %arg3[%c0_2, %c0_3] : memref<16x128xf32, #tpu.memory_space<vmem>>, vector<16x128xf32>
    %8 = arith.subf %6, %7 : vector<16x128xf32>
    %9 = arith.mulf %8, %8 : vector<16x128xf32>
    %10 = tpu.iota {dimensions = array<i32: 0>} : vector<16x128xi32>
    %11 = vector.broadcast %5 : i32 to vector<16x128xi32>
    %12 = arith.addi %11, %10 : vector<16x128xi32>
    %c16_i32_4 = arith.constant 16 : i32
    %13 = vector.broadcast %c16_i32_4 : i32 to vector<16x128xi32>
    %14 = arith.cmpi slt, %12, %13 : vector<16x128xi32>
    %cst = arith.constant 0.000000e+00 : f32
    %15 = vector.broadcast %cst : f32 to vector<16x128xf32>
    %16 = arith.select %14, %9, %15 : vector<16x128xi1>, vector<16x128xf32>
    %17 = vector.shape_cast %16 : vector<16x128xf32> to vector<2x8x128xf32>
    %cst_5 = arith.constant dense<0.000000e+00> : vector<8x128xf32>
    %18 = vector.multi_reduction <add>, %17, %cst_5 [0] : vector<2x8x128xf32> to vector<8x128xf32>
    %c0_6 = arith.constant 0 : index
    %c0_7 = arith.constant 0 : index
    %19 = vector.load %arg5[%c0_6, %c0_7] : memref<8x128xf32, #tpu.memory_space<vmem>>, vector<8x128xf32>
    %20 = arith.addf %19, %18 : vector<8x128xf32>
    %c0_8 = arith.constant 0 : index
    %c0_9 = arith.constant 0 : index
    %21 = vector.load %arg5[%c0_8, %c0_9] : memref<8x128xf32, #tpu.memory_space<vmem>>, vector<8x128xf32>
    tpu.vector_store %arg5[%c0_8, %c0_9], %20 {strides = array<i32>} : memref<8x128xf32, #tpu.memory_space<vmem>>, vector<8x128xf32>,
    %c0_i32_10 = arith.constant 0 : i32
    %22 = arith.cmpi eq, %arg1, %c0_i32_10 : i32
    %23 = arith.extui %22 : i1 to i32
    %c0_i32_11 = arith.constant 0 : i32
    %24 = arith.cmpi ne, %23, %c0_i32_11 : i32
    scf.if %24 {
      %c0_12 = arith.constant 0 : index
      %c0_13 = arith.constant 0 : index
      %25 = vector.load %arg5[%c0_12, %c0_13] : memref<8x128xf32, #tpu.memory_space<vmem>>, vector<8x128xf32>
      %c0_14 = arith.constant 0 : index
      %c0_15 = arith.constant 0 : index
      %c0_16 = arith.constant 0 : index
      %26 = vector.load %arg4[%c0_14, %c0_15, %c0_16] : memref<1x8x128xf32, #tpu.memory_space<vmem>>, vector<1x8x128xf32>
      %27 = vector.shape_cast %26 : vector<1x8x128xf32> to vector<8x128xf32>
      %28 = vector.shape_cast %25 : vector<8x128xf32> to vector<1x8x128xf32>
      tpu.vector_store %arg4[%c0_14, %c0_15, %c0_16], %28 {strides = array<i32>} : memref<1x8x128xf32, #tpu.memory_space<vmem>>, vector<1x8x128xf32>,
    } else {
    }
    return
  }
  func.func @transform_0(%arg0: i32, %arg1: i32) -> (i32, i32) {
    %c1_i32 = arith.constant 1 : i32
    %0 = arith.muli %arg0, %c1_i32 : i32
    %1 = arith.addi %0, %arg1 : i32
    %c0_i32 = arith.constant 0 : i32
    %2 = arith.minsi %1, %c0_i32 : i32
    %c0_i32_0 = arith.constant 0 : i32
    %c0_i32_1 = arith.constant 0 : i32
    return %2, %c0_i32_0 : i32, i32
  }
  func.func @transform_1(%arg0: i32, %arg1: i32) -> (i32, i32) {
    %c1_i32 = arith.constant 1 : i32
    %0 = arith.muli %arg0, %c1_i32 : i32
    %1 = arith.addi %0, %arg1 : i32
    %c0_i32 = arith.constant 0 : i32
    %2 = arith.minsi %1, %c0_i32 : i32
    %c0_i32_0 = arith.constant 0 : i32
    %c0_i32_1 = arith.constant 0 : i32
    return %2, %c0_i32_0 : i32, i32
  }
  func.func @transform_2(%arg0: i32, %arg1: i32) -> (i32, i32, i32) {
    %c0_i32 = arith.constant 0 : i32
    %c0_i32_0 = arith.constant 0 : i32
    %c0_i32_1 = arith.constant 0 : i32
    return %arg0, %c0_i32, %c0_i32_0 : i32, i32, i32
  }
}

</mosaic_0001>

<bundles_post_ra>
// kernel: tpu_custom_call.1
= control target key start
LH: loop header
LB: loop body
LE: loop exit
PB: predicated region body
PF: predicated region fallthrough
CT: control target
= control target key end

     0   :  { %7 = vsyncpa [#allocation4], 0  ;;  %s247_s0 = inlined_call_operand.hbm [shape: f32[16,128], index: 0, kind: input, shape index: {}]   ;;  %s248_s1 = inlined_call_operand.hbm [shape: f32[16,128], index: 1, kind: input, shape index: {}]   ;;  %s249_s2 = inlined_call_operand.hbm [shape: f32[1,8,128], index: 2, kind: output, shape index: {}]  }
   0x1   :  { %8 = vsyncpa [#allocation7], 0 }
   0x2   :  { %9 = vsyncpa [#allocation5], 0  ;;  %s191_s9 = smov [#allocation3]   ;;  %s119_s13 = scalar_lea.hbm %s247_s0, 256 }
   0x3   :  { %s21_s10 = sshll.u32 %s191_s9, 4  ;;  %p120_p0 = scmp.ne.s32.totalorder %s247_s0, %s119_s13  ;;  %s22_s10 = int_to_ptr.vmem [resolvable:$true] %s21_s10 }
   0x4   :  { %p123_p1 = scmp.lt.u32.totalorder %s119_s13, %s247_s0 }
   0x6   :  { %p125_p2 = pnand %p123_p1, %p120_p0 }
   0x8   :  { %128 = shalt.err (!%p125_p2)
}
   0x9   :  { %s129_s18 = scalar_lea.vmem %s22_s10, 256  ;;  %p134_p4 = scmp.lt.s32.totalorder %s22_s10, %s22_s10 }
   0xa   :  { %p130_p3 = scmp.ne.s32.totalorder %s22_s10, %s129_s18  ;;  %p135_p5 = scmp.lt.s32.totalorder %s129_s18, %s129_s18 }
   0xc   :  { %p136_p6 = por %p135_p5, %p134_p4 }
   0xe   :  { %p137_p7 = pnand %p136_p6, %p130_p3 }
  0x10   :  { %140 = shalt.err (!%p137_p7)
}
  0x11   :  { %s192_s19 = smov 128   ;;  %s193_s20 = smov 8  }
  0x12   :  { %27 = dma.hbm_to_vmem [thread:$0]  %s247_s0, 256, %s22_s10, [#allocation4], %s192_s19, %s192_s19, %s193_s20  }
  0x13   :  { %s194_s23 = smov [#allocation6]   ;;  %s141_s27 = scalar_lea.hbm %s248_s1, 256 }
  0x14   :  { %s39_s24 = sshll.u32 %s194_s23, 4  ;;  %p142_p8 = scmp.ne.s32.totalorder %s248_s1, %s141_s27  ;;  %s40_s24 = int_to_ptr.vmem [resolvable:$true] %s39_s24 }
  0x15   :  { %p145_p9 = scmp.lt.u32.totalorder %s141_s27, %s248_s1 }
  0x17   :  { %p147_p10 = pnand %p145_p9, %p142_p8 }
  0x19   :  { %150 = shalt.err (!%p147_p10)
}
  0x1a   :  { %s151_s4 = scalar_lea.vmem %s40_s24, 256  ;;  %p156_p12 = scmp.lt.s32.totalorder %s40_s24, %s40_s24 }
  0x1b   :  { %p152_p11 = scmp.ne.s32.totalorder %s40_s24, %s151_s4  ;;  %p157_p13 = scmp.lt.s32.totalorder %s151_s4, %s151_s4 }
  0x1d   :  { %p158_p0 = por %p157_p13, %p156_p12 }
  0x1f   :  { %p159_p1 = pnand %p158_p0, %p152_p11 }
  0x21   :  { %162 = shalt.err (!%p159_p1)
}
  0x22   :  { %45 = dma.hbm_to_vmem [thread:$0]  %s248_s1, 256, %s40_s24, [#allocation7], %s192_s19, %s192_s19, %s193_s20  }
  0x23   :  { %185 = dma.done.wait [#allocation4], 256  }
  0x24   :  { %186 = vsyncadd [#allocation4], 4294967040 }
  0x25   :  { %187 = dma.done.wait [#allocation7], 256  }
  0x26   :  { %188 = vsyncadd [#allocation7], 4294967040  ;;  %v67_v0 = vld [vmem:[#allocation3] sm:$0xff]  ;;  %v68_v1 = vld [vmem:[#allocation3 + $0x8] sm:$0xff]  ;;  %s195_s6 = smov [#allocation8]  }
  0x27   :  { %v69_v2 = vld [vmem:[#allocation6] sm:$0xff]  ;;  %v70_v3 = vld [vmem:[#allocation6 + $0x8] sm:$0xff]  ;;  %s100_s7 = sshll.u32 %s195_s6, 4  ;;  %s101_s7 = int_to_ptr.vmem [resolvable:$true] %s100_s7 }
  0x28   :  { %v71_v4 = vsub.f32 %v67_v0, %v69_v2  ;;  %v72_v5 = vsub.f32 %v68_v1, %v70_v3  ;;  %s163_s8 = scalar_lea.vmem %s101_s7, 128  ;;  %p168_p3 = scmp.lt.s32.totalorder %s101_s7, %s101_s7 }
  0x29   :  { %p164_p2 = scmp.ne.s32.totalorder %s101_s7, %s163_s8  ;;  %p169_p4 = scmp.lt.s32.totalorder %s163_s8, %s163_s8 }
  0x2a   :  { %v73_v6 = vmul.f32 %v71_v4, %v71_v4  ;;  %v74_v7 = vmul.f32 %v72_v5, %v72_v5 }
  0x2b   :  { %p170_p5 = por %p169_p4, %p168_p3 }
  0x2c   :  { %v85_v8 = vadd.f32 %v74_v7, %v73_v6 }
  0x2d   :  { %p171_p6 = pnand %p170_p5, %p164_p2 }
  0x2e   :  { %93 = vst [vmem:[#allocation8] sm:$0xff] %v85_v8 }
  0x2f   :  { %174 = shalt.err (!%p171_p6)
}
  0x30   :  { %s175_s10 = scalar_lea.hbm %s249_s2, 128 }
  0x31   :  { %p176_p7 = scmp.ne.s32.totalorder %s249_s2, %s175_s10  ;;  %p179_p8 = scmp.lt.u32.totalorder %s175_s10, %s249_s2 }
  0x33   :  { %p181_p9 = pnand %p179_p8, %p176_p7 }
  0x35   :  { %184 = shalt.err (!%p181_p9)
}
  0x36   :  { %103 = dma.vmem_to_hbm [thread:$0]  %s101_s7, 128, %s249_s2, [#allocation5]  }
  0x37   :  { %189 = dma.done.wait [#allocation5], 128  }
  0x38   :  { %190 = vsyncadd [#allocation5], 4294967168 }
  0x39   :  { %107 = vsyncpa [#allocation4], 1 }
  0x3a   :  { %108 = vsyncpa [#allocation7], 1 }
  0x3b   :  { %109 = vsyncpa [#allocation5], 1 }

</bundles_post_ra>
